<compile_context>
chip_gen: v5e
topology: v5e:2x2
jax: 0.10.0
libtpu: 0.0.40
codegen_flags: <defaults>
</compile_context>

<pallas_src>
import functools

import jax
import jax.numpy as jnp
from jax.experimental import pallas as pl
from jax.experimental.pallas import tpu as pltpu


def fccat_kernel(x_ref, w_ref, out_ref, acc_ref, *, n_in, tk, tn, w_resident):
    # x_ref:   (tm, nIn)                 VMEM, resident across (j, k) for batch tile i
    # w_ref:   (nIn, nOut) if resident, else (tk, tn) tile of pre-transposed W
    # out_ref: (tm, nIn + nOut)          VMEM, resident across (j, k) for batch tile i
    # acc_ref: (tm, tn) f32              VMEM scratch accumulator
    j = pl.program_id(1)
    k = pl.program_id(2)

    # ---- copy-through half of the concat: out[:, :nIn] = x -----------------
    # One long unmasked lane-dense store, exactly once per batch tile.
    @pl.when((j == 0) & (k == 0))
    def _():
        out_ref[:, :n_in] = x_ref[...]

    # ---- fc half: out[:, nIn:] = x @ W.T (tiled matmul, f32 accumulate) ----
    @pl.when(k == 0)
    def _():
        acc_ref[...] = jnp.zeros_like(acc_ref)

    kcol = pl.multiple_of(k * tk, 128)
    x_tile = x_ref[:, pl.ds(kcol, tk)]
    if w_resident:
        jcol = pl.multiple_of(j * tn, 128)
        w_tile = w_ref[pl.ds(kcol, tk), pl.ds(jcol, tn)]
    else:
        w_tile = w_ref[...]

    # Plain (tm, tk) @ (tk, tn): W was transposed once in the wrapper, so there
    # is no per-tile vxpose on the MXU critical path.
    acc_ref[...] += jnp.dot(x_tile, w_tile, preferred_element_type=jnp.float32)

    @pl.when(k == pl.num_programs(2) - 1)
    def _():
        col = pl.multiple_of(n_in + j * tn, 128)
        out_ref[:, pl.ds(col, tn)] = acc_ref[...].astype(out_ref.dtype)


def _vmem_budget_bytes():
    """~75% of physical VMEM: ~96 MiB on v5e/v6e (128 MiB), ~48 MiB on v7x (64 MiB)."""
    try:
        phys = int(getattr(pltpu.get_tpu_info(), "vmem_capacity_bytes"))
    except Exception:  # query unavailable: assume v7x-sized (smallest) VMEM
        phys = 64 * 1024 * 1024
    return (phys * 3) // 4


def _pick_tile(dim, cap):
    """Largest multiple-of-128 tile <= cap that divides dim (dim % 128 == 0)."""
    cap = max(cap, 128)  # guard: never let a small cap drive the tile to 0
    t = min(dim, cap)
    t -= t % 128
    while dim % t:
        t -= 128
    return t


def _pick_batch_tile(n_batch, cap, sublane):
    """Largest tile <= cap dividing n_batch, preferring 256/128/sublane alignment."""
    cap = max(cap, sublane)
    if n_batch <= cap:
        return n_batch  # block == full dim is always legal
    for align in (256, 128, sublane):
        t = (cap // align) * align
        while t >= align:
            if n_batch % t == 0:
                return t
            t -= align
    return n_batch  # no aligned divisor: fall back to untiled batch


def fccat(x, w, *, tm_cap=512, tn_cap=512, tk_cap=512):
    """x: (nBatch, nIn); w: (nOut, nIn) in PyTorch nn.Linear layout (no bias).

    Returns (nBatch, nIn + nOut) = concat([x, x @ w.T], axis=1).
    """
    n_batch, n_in = x.shape
    n_out, n_in_w = w.shape
    assert n_in_w == n_in, "weight shape must be (nOut, nIn)"
    # Lane alignment for the concat stores; pad nIn/nOut to 128 multiples otherwise.
    assert n_in % 128 == 0 and n_out % 128 == 0, "nIn and nOut must be multiples of 128"

    # One-time HBM transpose of W (amortized over all batch tiles): the in-kernel
    # contraction becomes a plain (tm,tk)@(tk,tn) dot with no per-tile transpose.
    w_t = w.T  # (nIn, nOut)

    budget = _vmem_budget_bytes()
    tk = _pick_tile(n_in, tk_cap)
    tn = _pick_tile(n_out, tn_cap)

    x_b = x.dtype.itemsize
    w_b = w_t.dtype.itemsize
    out_b = x.dtype.itemsize

    # Keep the whole pre-transposed W VMEM-resident when it fits comfortably:
    # its block index never changes, so it is DMA'd from HBM exactly once
    # (instead of once per batch tile).  2x accounts for its double buffer.
    w_full_bytes = 2 * n_in * n_out * w_b
    w_resident = w_full_bytes <= budget // 3
    w_bytes = w_full_bytes if w_resident else 3 * tk * tn * w_b

    # VMEM per batch row: double-buffered resident output row-block +
    # double-buffered resident x row-block + the f32 accumulator column.
    per_row = 2 * (n_in + n_out) * out_b + 2 * n_in * x_b + 4 * tn
    tm_budget = max((budget - w_bytes) // per_row, 8)
    sublane = max(8, 32 // x_b)  # sublane packing: f32->8, bf16->16, 8-bit->32
    tm = _pick_batch_tile(n_batch, min(tm_cap, tm_budget), sublane)
    # TODO(synk): on v7x (2 TensorCores) prefer a tm giving nBatch/tm >= 2 so the
    # "parallel" batch axis actually shards across both cores.

    grid = (n_batch // tm, n_out // tn, n_in // tk)

    if w_resident:
        w_spec = pl.BlockSpec((n_in, n_out), lambda i, j, k: (0, 0))
    elif tm < 256:
        # Small batch tiles finish the (tk, tn) matmul faster than the next W
        # DMA; a third buffer hides the exposed HBM latency.
        w_spec = pl.BlockSpec((tk, tn), lambda i, j, k: (k, j),
                              pipeline_mode=pl.Buffered(3))
    else:
        w_spec = pl.BlockSpec((tk, tn), lambda i, j, k: (k, j))

    kernel = functools.partial(fccat_kernel, n_in=n_in, tk=tk, tn=tn,
                               w_resident=w_resident)

    return pl.pallas_call(
        kernel,
        out_shape=jax.ShapeDtypeStruct((n_batch, n_in + n_out), x.dtype),
        grid_spec=pltpu.PrefetchScalarGridSpec(
            num_scalar_prefetch=0,
            grid=grid,
            in_specs=[
                # x row-block: resident across (j, k) -> read from HBM once per i.
                pl.BlockSpec((tm, n_in), lambda i, j, k: (i, 0)),
                w_spec,
            ],
            # Full concat row-block for batch tile i: resident across (j, k),
            # flushed to HBM once per i.
            # TODO(synk): if still VMEM-bound on v7x, add pipeline_mode=pl.Buffered(1)
            # here to drop the second output buffer.
            out_specs=pl.BlockSpec((tm, n_in + n_out), lambda i, j, k: (i, 0)),
            scratch_shapes=[pltpu.VMEM((tm, tn), jnp.float32)],
        ),
        compiler_params=pltpu.CompilerParams(
            # Batch axis is parallel (megacore); N/K stay arbitrary because the
            # concat output block (and x block) are resident across them.
            dimension_semantics=("parallel", "arbitrary", "arbitrary"),
            vmem_limit_bytes=budget,
        ),
    )(x, w_t)


if __name__ == "__main__":
    # Small, lane-aligned shapes that still exercise the (j, k) tiling:
    # caps of 128 give grid = (1, 2, 2).
    nBatch, nIn, nOut = 8, 256, 256

    key = jax.random.PRNGKey(0)
    kx, kw = jax.random.split(key)
    x = jax.random.normal(kx, (nBatch, nIn), dtype=jnp.float32)
    # Deterministic in-script init of fc weight (PyTorch layout (nOut, nIn), no bias).
    w = jax.random.normal(kw, (nOut, nIn), dtype=jnp.float32) * (1.0 / jnp.sqrt(nIn))

    out = fccat(x, w, tn_cap=128, tk_cap=128)
    jax.block_until_ready(out)

    # Reference: cat((x, x @ W.T), dim=1) with a high-precision matmul.
    ref_fc = jax.lax.dot_general(
        x, w, dimension_numbers=(((1,), (1,)), ((), ())),
        precision=jax.lax.Precision.HIGHEST)
    ref = jnp.concatenate([x, ref_fc], axis=1)

    assert out.shape == (nBatch, nIn + nOut)
    tol = 1e-3 * max(1.0, (nIn / 256.0) ** 0.5)  # MXU f32 error grows ~sqrt(K)
    assert jnp.allclose(out, ref, atol=tol, rtol=tol)

    print("KERNEL_OK")
</pallas_src>

<mosaic_0001>
module attributes {stable_mosaic.version = 11 : i64} {
  func.func @fccat_kernel(%arg0: i32, %arg1: i32, %arg2: i32, %arg3: memref<8x256xf32, #tpu.memory_space<vmem>>, %arg4: memref<256x256xf32, #tpu.memory_space<vmem>>, %arg5: memref<8x512xf32, #tpu.memory_space<vmem>>, %arg6: memref<8x128xf32, #tpu.memory_space<vmem>>) attributes {dimension_semantics = [#tpu.dimension_semantics<parallel>, #tpu.dimension_semantics<arbitrary>, #tpu.dimension_semantics<arbitrary>], iteration_bounds = array<i64: 1, 2, 2>, scalar_prefetch = 0 : i64, scratch_operands = 1 : i64, tpu.core_type = #tpu.core_type<tc>, window_params = [{transform_indices = @transform_0, window_bounds = array<i64: 8, 256>}, {pipeline_mode = #tpu.pipeline_mode<synchronous>, transform_indices = @transform_1, window_bounds = array<i64: 256, 256>}, {transform_indices = @transform_2, window_bounds = array<i64: 8, 512>}]} {
    %c0_i32 = arith.constant 0 : i32
    %0 = arith.cmpi eq, %arg1, %c0_i32 : i32
    %c0_i32_0 = arith.constant 0 : i32
    %1 = arith.cmpi eq, %arg2, %c0_i32_0 : i32
    %2 = arith.andi %0, %1 : i1
    %3 = arith.extui %2 : i1 to i32
    %c0_i32_1 = arith.constant 0 : i32
    %4 = arith.cmpi ne, %3, %c0_i32_1 : i32
    scf.if %4 {
      %c0_10 = arith.constant 0 : index
      %c0_11 = arith.constant 0 : index
      %24 = vector.load %arg3[%c0_10, %c0_11] : memref<8x256xf32, #tpu.memory_space<vmem>>, vector<8x256xf32>
      %c0_12 = arith.constant 0 : index
      %c0_13 = arith.constant 0 : index
      %25 = vector.load %arg5[%c0_12, %c0_13] : memref<8x512xf32, #tpu.memory_space<vmem>>, vector<8x256xf32>
      tpu.vector_store %arg5[%c0_12, %c0_13], %24 {strides = array<i32>} : memref<8x512xf32, #tpu.memory_space<vmem>>, vector<8x256xf32>,
    } else {
    }
    %c0_i32_2 = arith.constant 0 : i32
    %5 = arith.cmpi eq, %arg2, %c0_i32_2 : i32
    %6 = arith.extui %5 : i1 to i32
    %c0_i32_3 = arith.constant 0 : i32
    %7 = arith.cmpi ne, %6, %c0_i32_3 : i32
    scf.if %7 {
      %cst_10 = arith.constant 0.000000e+00 : f32
      %24 = vector.broadcast %cst_10 : f32 to vector<8x128xf32>
      %c0_11 = arith.constant 0 : index
      %c0_12 = arith.constant 0 : index
      %25 = vector.load %arg6[%c0_11, %c0_12] : memref<8x128xf32, #tpu.memory_space<vmem>>, vector<8x128xf32>
      tpu.vector_store %arg6[%c0_11, %c0_12], %24 {strides = array<i32>} : memref<8x128xf32, #tpu.memory_space<vmem>>, vector<8x128xf32>,
    } else {
    }
    %c128_i32 = arith.constant 128 : i32
    %8 = arith.muli %arg2, %c128_i32 : i32
    %9 = tpu.assume_multiple %8, 128 : i32
    %c0 = arith.constant 0 : index
    %10 = arith.index_cast %9 : i32 to index
    %11 = vector.load %arg3[%c0, %10] : memref<8x256xf32, #tpu.memory_space<vmem>>, vector<8x128xf32>
    %c128_i32_4 = arith.constant 128 : i32
    %12 = arith.muli %arg1, %c128_i32_4 : i32
    %13 = tpu.assume_multiple %12, 128 : i32
    %14 = arith.index_cast %9 : i32 to index
    %15 = arith.index_cast %13 : i32 to index
    %16 = vector.load %arg4[%14, %15] : memref<256x256xf32, #tpu.memory_space<vmem>>, vector<128x128xf32>
    %c0_5 = arith.constant 0 : index
    %c0_6 = arith.constant 0 : index
    %17 = vector.load %arg6[%c0_5, %c0_6] : memref<8x128xf32, #tpu.memory_space<vmem>>, vector<8x128xf32>
    %cst = arith.constant dense<0.000000e+00> : vector<8x128xf32>
    %18 = tpu.matmul %11, %16, %cst {dimension_numbers = #tpu.dot_dimension_numbers<[1], [0], [0], [1], [0, 0, 1, 1], [], []>} : vector<8x128xf32>, vector<128x128xf32>, vector<8x128xf32> -> vector<8x128xf32>
    %19 = arith.addf %17, %18 : vector<8x128xf32>
    %c0_7 = arith.constant 0 : index
    %c0_8 = arith.constant 0 : index
    %20 = vector.load %arg6[%c0_7, %c0_8] : memref<8x128xf32, #tpu.memory_space<vmem>>, vector<8x128xf32>
    tpu.vector_store %arg6[%c0_7, %c0_8], %19 {strides = array<i32>} : memref<8x128xf32, #tpu.memory_space<vmem>>, vector<8x128xf32>,
    %c1_i32 = arith.constant 1 : i32
    %21 = arith.cmpi eq, %arg2, %c1_i32 : i32
    %22 = arith.extui %21 : i1 to i32
    %c0_i32_9 = arith.constant 0 : i32
    %23 = arith.cmpi ne, %22, %c0_i32_9 : i32
    scf.if %23 {
      %c128_i32_10 = arith.constant 128 : i32
      %24 = arith.muli %arg1, %c128_i32_10 : i32
      %c256_i32 = arith.constant 256 : i32
      %25 = arith.addi %c256_i32, %24 : i32
      %26 = tpu.assume_multiple %25, 128 : i32
      %c0_11 = arith.constant 0 : index
      %c0_12 = arith.constant 0 : index
      %27 = vector.load %arg6[%c0_11, %c0_12] : memref<8x128xf32, #tpu.memory_space<vmem>>, vector<8x128xf32>
      %c0_13 = arith.constant 0 : index
      %28 = arith.index_cast %26 : i32 to index
      %29 = vector.load %arg5[%c0_13, %28] : memref<8x512xf32, #tpu.memory_space<vmem>>, vector<8x128xf32>
      tpu.vector_store %arg5[%c0_13, %28], %27 {strides = array<i32>} : memref<8x512xf32, #tpu.memory_space<vmem>>, vector<8x128xf32>,
    } else {
    }
    return
  }
  func.func @transform_0(%arg0: i32, %arg1: i32, %arg2: i32) -> (i32, i32) {
    %c0_i32 = arith.constant 0 : i32
    %c0_i32_0 = arith.constant 0 : i32
    return %arg0, %c0_i32 : i32, i32
  }
  func.func @transform_1(%arg0: i32, %arg1: i32, %arg2: i32) -> (i32, i32) {
    %c0_i32 = arith.constant 0 : i32
    %c0_i32_0 = arith.constant 0 : i32
    %c0_i32_1 = arith.constant 0 : i32
    return %c0_i32, %c0_i32_0 : i32, i32
  }
  func.func @transform_2(%arg0: i32, %arg1: i32, %arg2: i32) -> (i32, i32) {
    %c0_i32 = arith.constant 0 : i32
    %c0_i32_0 = arith.constant 0 : i32
    return %arg0, %c0_i32 : i32, i32
  }
}

</mosaic_0001>

<bundles_post_ra>
// kernel: tpu_custom_call.1
= control target key start
LH: loop header
LB: loop body
LE: loop exit
PB: predicated region body
PF: predicated region fallthrough
CT: control target
= control target key end

     0   :  { %7 = vsyncpa [#allocation4], 0  ;;  %s709_s0 = inlined_call_operand.hbm [shape: f32[8,256], index: 0, kind: input, shape index: {}]   ;;  %s710_s1 = inlined_call_operand.hbm [shape: f32[256,256], index: 1, kind: input, shape index: {}]   ;;  %s711_s2 = inlined_call_operand.hbm [shape: f32[8,512], index: 2, kind: output, shape index: {}]  }
   0x1   :  { %8 = vsyncpa [#allocation7], 0 }
   0x2   :  { %9 = vsyncpa [#allocation5], 0  ;;  %s592_s9 = smov 0   ;;  %s594_s10 = smov 0  }
   0x3   :  { %s596_s11 = smov 0   ;;  %s598_s12 = smov 0  }
   0x4   :  { %s600_s13 = smov 0  }
   0x5 LB: > { %s341_s14 = sadd.s32 4294967295, %s569_s13   ;;  %s27_s15 = sadd.s32 1, %s561_s11  ;;  %s569_s13 = sphi %s600_s13, %s15_s13   ;;  %s565_s12 = sphi %s598_s12, %s717_s12   ;;  %s561_s11 = sphi %s596_s11, %s716_s11   ;;  %s557_s10 = sphi %s594_s10, %s715_s10   ;;  %s553_s9 = sphi %s592_s9, %s714_s9  }
   0x6   : > { %p28_p0 = scmp.ge.s32.totalorder %s27_s15, 2  ;;  %s30_s16 = sadd.s32 1, %s565_s12 }
   0x7   : > { %p342_p1 = scmp.ge.s32.totalorder %s569_s13, 1  ;;  %p112_p2 = scmp.lt.s32.totalorder %s569_s13, 5 }
   0x8   : > { %s719_s15 = smov (%p28_p0, %s27_s15), 0  ;;  %s721_s16 = smov (!%p28_p0, %s30_s16), %s565_s12 }
   0x9   : > { %p625_p3 = pnand %p342_p1, %p112_p2  ;;  %p32_p4 = scmp.ge.s32.totalorder %s721_s16, 2 }
   0xa   : > { %p631_p5 = scmp.eq.s32.totalorder %s341_s14, 0  ;;  %s127_s21 = sshll.u32 %s709_s0, 4  ;;  %s128_s21 = int_to_ptr.hbm [resolvable:$true] %s127_s21 }
   0xb   : > { %p372_p6 = pneg %p625_p3  ;;  %s723_s16 = smov (%p32_p4, %s721_s16), 0 }
   0xc   : > { %s571_s22 = smov [#allocation3]   ;;  %s138_s26 = sshll.u32 %s710_s1, 4  ;;  %s139_s26 = int_to_ptr.hbm [resolvable:$true] %s138_s26 }
   0xd   : > { %s129_s23 = sshll.u32 %s571_s22, 4  ;;  %p373_p7 = pnand %p631_p5, %p372_p6  ;;  %s130_s23 = int_to_ptr.vmem [resolvable:$true] %s129_s23 }
   0xe   : > { %s572_s27 = smov [#allocation6]   ;;  %s573_s29 = smov 256  }
   0xf   : > { %375 = dma.hbm_to_vmem [thread:$0]  (!%p373_p7), %s128_s21, 256, %s130_s23, [#allocation4]  }
  0x10   : > { %s140_s28 = sshll.u32 %s572_s27, 4  ;;  %s574_s30 = smov 16   ;;  %s141_s28 = int_to_ptr.vmem [resolvable:$true] %s140_s28 }
  0x11   : > { %378 = dma.hbm_to_vmem [thread:$0]  (!%p373_p7), %s139_s26, 8192, %s141_s28, [#allocation7], %s573_s29, %s573_s29, %s574_s30  }
  0x12   : > { %156 = sbr.rel (%p625_p3) target bundleno = 228 (0xe4), region = 28 }
  0x17   : > { %540 = dma.done.wait (%p631_p5), [#allocation4], 256  }
  0x18   : > { %542 = vsyncadd (%p631_p5), [#allocation4], 4294967040 }
  0x19   : > { %544 = dma.done.wait (%p631_p5), [#allocation7], 8192  }
  0x1a   : > { %546 = vsyncadd (%p631_p5), [#allocation7], 4294959104  ;;  %p174_p8 = scmp.eq.s32.totalorder %s557_s10, 0  ;;  %p175_p9 = scmp.eq.s32.totalorder %s553_s9, 0 }
  0x1c   : > { %p176_p10 = pnand %p175_p9, %p174_p8 }
  0x1e   : > { %179 = sbr.rel (%p176_p10) target bundleno = 38 (0x26), region = 40 }
  0x23   : > { %v180_v0 = vld [vmem:[#allocation3] sm:$0xff]  ;;  %v181_v1 = vld [vmem:[#allocation3 + $0x8] sm:$0xff] }
  0x24   : > { %182 = vst [vmem:[#allocation8] sm:$0xff] %v180_v0 }
  0x25   : > { %183 = vst [vmem:[#allocation8 + $0x8] sm:$0xff] %v181_v1 }
  0x26 PF: > { %p348_p11 = scmp.ne.s32.totalorder %s553_s9, 0 }
  0x28   : > { %186 = sbr.rel (%p348_p11) target bundleno = 47 (0x2f), region = 44 }
  0x2d   : > { %v575_v2 = vmov 0.0  }
  0x2e   : > { %187 = vst [vmem:[#allocation2] sm:$0xff] %v575_v2 }
  0x2f PF: > { %s349_s3 = sshll.u32 %s553_s9, 7  ;;  %s351_s4 = sshll.u32 %s557_s10, 7 }
  0x30   : > { %s195_s5 = sshra.s32 %s351_s4, 7  ;;  %s197_s6 = sshra.s32 %s349_s3, 3 }
  0x31   : > { %s352_s7 = sshll.u32 %s197_s6, 1  ;;  %s189_s19 = sshra.s32 %s349_s3, 7 }
  0x32   : > { %s200_s8 = sadd.s32 %s352_s7, %s195_s5  ;;  %s350_s20 = sshll.u32 %s189_s19, 3 }
  0x33   : > { %s353_s17 = sshll.u32 %s200_s8, 3  ;;  %s192_s21 = scalar_lea.vmem [#allocation3], %s350_s20 }
  0x34   : > { %s666_s18 = scalar_lea.vmem [#allocation6], %s353_s17  ;;  %v193_v19 = vld [vmem:[%s192_s21] sm:$0xff]  ;;  %p354_p12 = scmp.ne.s32.totalorder %s553_s9, 1 }
  0x35   : > { %v218_v3 = vld [vmem:[%s666_s18 + $0xf0] sm:$0xff]  ;;  %v217_v4 = vld [vmem:[%s666_s18 + $0xe0] sm:$0xff]  ;;  %s246_s22 = sadd.s32 (!%p354_p12), 256, %s351_s4 }
  0x36   : > { %220 = vmatpush.msra.mxu0 %v218_v3  ;;  %v216_v5 = vld [vmem:[%s666_s18 + $0xd0] sm:$0xff]  ;;  %v215_v6 = vld [vmem:[%s666_s18 + $0xc0] sm:$0xff]  ;;  %s248_s23 = sshra.s32 (!%p354_p12), %s246_s22, 7 }
  0x37   : > { %v214_v7 = vld [vmem:[%s666_s18 + $0xb0] sm:$0xff]  ;;  %v213_v8 = vld [vmem:[%s666_s18 + $0xa0] sm:$0xff]  ;;  %s355_s24 = sshll.u32 (!%p354_p12), %s248_s23, 3 }
  0x38   : > { %221 = vmatpush.msra.mxu0 %v217_v4  ;;  %v212_v9 = vld [vmem:[%s666_s18 + $0x90] sm:$0xff]  ;;  %v211_v10 = vld [vmem:[%s666_s18 + $0x80] sm:$0xff]  ;;  %s251_s25 = scalar_lea.vmem (!%p354_p12), [#allocation8], %s355_s24 }
  0x39   : > { %v210_v11 = vld [vmem:[%s666_s18 + $0x70] sm:$0xff]  ;;  %v209_v12 = vld [vmem:[%s666_s18 + $0x60] sm:$0xff] }
  0x3a   : > { %222 = vmatpush.msra.mxu0 %v216_v5  ;;  %v208_v13 = vld [vmem:[%s666_s18 + $0x50] sm:$0xff]  ;;  %v207_v14 = vld [vmem:[%s666_s18 + $0x40] sm:$0xff] }
  0x3b   : > { %v206_v15 = vld [vmem:[%s666_s18 + $0x30] sm:$0xff]  ;;  %v205_v16 = vld [vmem:[%s666_s18 + $0x20] sm:$0xff] }
  0x3c   : > { %223 = vmatpush.msra.mxu0 %v215_v6  ;;  %v204_v17 = vld [vmem:[%s666_s18 + $0x10] sm:$0xff]  ;;  %v203_v18 = vld [vmem:[%s666_s18] sm:$0xff] }
  0x3d   : > { %v219_v20 = vld [vmem:[#allocation2] sm:$0xff] }
  0x3e   : > { %224 = vmatpush.msra.mxu0 %v214_v7 }
  0x40   : > { %225 = vmatpush.msra.mxu0 %v213_v8 }
  0x42   : > { %226 = vmatpush.msra.mxu0 %v212_v9 }
  0x44   : > { %227 = vmatpush.msra.mxu0 %v211_v10 }
  0x46   : > { %228 = vmatpush.msra.mxu0 %v210_v11 }
  0x48   : > { %229 = vmatpush.msra.mxu0 %v209_v12 }
  0x4a   : > { %230 = vmatpush.msra.mxu0 %v208_v13 }
  0x4c   : > { %231 = vmatpush.msra.mxu0 %v207_v14 }
  0x4e   : > { %232 = vmatpush.msra.mxu0 %v206_v15 }
  0x50   : > { %233 = vmatpush.msra.mxu0 %v205_v16 }
  0x52   : > { %234 = vmatpush.msra.mxu0 %v204_v17 }
  0x54   : > { %235 = vmatpush.msra.mxu0 %v203_v18 }
  0x55   : > { %236 = vmatmul.f32.vlgmr.msra.gmra.mxu0 %v193_v19 }
  0xd1   : > { %245 = sbr.rel (%p354_p12) target bundleno = 222 (0xde), region = 48 }
  0xd2   : > { %v237_v21 = vpop.f32.mrf.mxu0 }
  0xd3   : > { %v240_v22 = vadd.f32 %v237_v21, %v219_v20 }
  0xd5   : > { %241 = vst [vmem:[#allocation2] sm:$0xff] %v240_v22 }
  0xdc   : > { %v247_v23 = vld [vmem:[#allocation2] sm:$0xff] }
  0xdd   : > { %252 = vst [vmem:[%s251_s25] sm:$0xff] %v247_v23 }
  0xde PF: > { %p383_p13 = scmp.eq.s32.totalorder %s341_s14, 3  ;;  %s264_s28 = sshll.u32 %s711_s2, 4  ;;  %s265_s28 = int_to_ptr.hbm [resolvable:$true] %s264_s28 }
  0xdf   : > { %s576_s29 = smov [#allocation8]  }
  0xe0   : > { %s262_s30 = sshll.u32 %s576_s29, 4  ;;  %s263_s30 = int_to_ptr.vmem [resolvable:$true] %s262_s30 }
  0xe1   : > { %369 = dma.vmem_to_hbm [thread:$0]  (%p383_p13), %s263_s30, 512, %s265_s28, [#allocation5]  }
  0xe2   : > { %548 = dma.done.wait (%p383_p13), [#allocation5], 512  }
  0xe3   : > { %550 = vsyncadd (%p383_p13), [#allocation5], 4294966784 }
  0xe4 PF: > { %s15_s13 = sadd.s32 1, %s569_s13   ;;  %s714_s9 = smov %s561_s11 }
  0xe5   : > { %p12_p0 = scmp.ge.s32.totalorder %s15_s13, 6   ;;  %s715_s10 = smov %s565_s12 }
  0xe6   : > { %s716_s11 = smov %s719_s15  ;;  %s717_s12 = smov %s723_s16 }
  0xe7   :  { %14 = sbr.rel (!%p12_p0) target bundleno = 5 (0x5), region = 78 }
  0xec   :  { %278 = vsyncpa [#allocation4], 1 }
  0xed   :  { %280 = vsyncpa [#allocation4 + $0x1], 1 }
  0xee   :  { %281 = vsyncpa [#allocation7], 1 }
  0xef   :  { %282 = vsyncpa [#allocation5], 1 }
  0xf0   :  { %284 = vsyncpa [#allocation5 + $0x1], 1 }

</bundles_post_ra>
